<compile_context>
chip_gen: v6e
topology: v6e:2x2x1
jax: 0.10.0
libtpu: 0.0.40
codegen_flags: <defaults>
</compile_context>

<pallas_src>
import itertools

import jax
import jax.numpy as jnp
from jax.experimental import pallas as pl
from jax.experimental.pallas import tpu as pltpu


# ---------------------------------------------------------------------------
# Static gather plan.
# After the 2x2x2 parity split, tap (kd,kh,kw) = phase (kd%2,kh%2,kw%2)
# shifted by (kd//2,kh//2,kw//2).  Taps sharing a shift are gathered together
# as contiguous row blocks of the phase array, so the whole 27-tap x Cin
# im2col becomes 14 static VMEM slices.  Weight columns are permuted once (in
# the wrapper) to match the resulting K order.
# ---------------------------------------------------------------------------
def _build_gather_plan(cin):
    chunks = []   # (src_row_start, n_rows, (sd, sh, sw), dst_row_start)
    perm = []     # new K index -> old K index (= (kd*9 + kh*3 + kw)*cin + ci)
    dst = 0
    for sd, sh, sw in itertools.product((0, 1), repeat=3):
        pds = (0, 1) if sd == 0 else (0,)
        phs = (0, 1) if sh == 0 else (0,)
        pws = (0, 1) if sw == 0 else (0,)
        phases = sorted(pd * 4 + ph * 2 + pw
                        for pd in pds for ph in phs for pw in pws)
        runs, run = [], [phases[0]]
        for p in phases[1:]:
            if p == run[-1] + 1:
                run.append(p)
            else:
                runs.append(run)
                run = [p]
        runs.append(run)
        for run in runs:
            chunks.append((run[0] * cin, len(run) * cin, (sd, sh, sw), dst))
            for p in run:
                pd, ph, pw = (p >> 2) & 1, (p >> 1) & 1, p & 1
                kd, kh, kw = 2 * sd + pd, 2 * sh + ph, 2 * sw + pw
                tap = (kd * 3 + kh) * 3 + kw
                for ci in range(cin):
                    perm.append(tap * cin + ci)
            dst += len(run) * cin
    return chunks, perm


# ---------------------------------------------------------------------------
# Pallas kernel: fused im2col gather (14 static slices) + one MXU matmul.
#   w_ref   : (Cout, K)            resident across all steps
#   src_ref : (8*Cin, Lm)          phase-decomposed input block for this step
#   o_ref   : (Cout, Lm_out)       lane-dense, channel-major output block
#   patch   : (K, Lm_out) scratch  im2col slab assembled in VMEM
# ---------------------------------------------------------------------------
def _fused_conv_pallas(w_new, src, *, chunks, ho, wo, tdo, lm_out, out_dtype):
    n, ndb, rows, lm = src.shape
    cout, k = w_new.shape
    wo1 = wo + 1
    p_plane = (ho + 1) * wo1

    def kernel(w_ref, src_ref, o_ref, patch_ref):
        # Assemble the (K, M') im2col slab: every stride-2 tap is a plain
        # (row-block, lane-offset) slice of the phase-decomposed block.
        for src_row, n_rows, (sd, sh, sw), dst_row in chunks:
            off = sd * p_plane + sh * wo1 + sw
            patch_ref[dst_row:dst_row + n_rows, :] = (
                src_ref[src_row:src_row + n_rows, off:off + lm_out])
        # One lane-dense MXU matmul per step: (Cout,K) @ (K,M') -> (Cout,M').
        o_ref[...] = jnp.dot(
            w_ref[...], patch_ref[...],
            preferred_element_type=jnp.float32).astype(o_ref.dtype)

    cost = pl.CostEstimate(
        flops=2 * cout * k * n * ndb * lm_out,
        transcendentals=0,
        bytes_accessed=(src.size * src.dtype.itemsize
                        + w_new.size * w_new.dtype.itemsize
                        + n * ndb * cout * lm_out * jnp.dtype(out_dtype).itemsize),
    )
    return pl.pallas_call(
        kernel,
        out_shape=jax.ShapeDtypeStruct((n, ndb, cout, lm_out), out_dtype),
        grid_spec=pltpu.PrefetchScalarGridSpec(
            num_scalar_prefetch=0,
            grid=(n, ndb),
            in_specs=[
                pl.BlockSpec((cout, k), lambda i, j: (0, 0)),          # weights
                pl.BlockSpec((None, None, rows, lm),                    # phases
                             lambda i, j: (i, j, 0, 0)),
            ],
            out_specs=pl.BlockSpec((None, None, cout, lm_out),
                                   lambda i, j: (i, j, 0, 0)),
            scratch_shapes=[pltpu.VMEM((k, lm_out), src.dtype)],
        ),
        compiler_params=pltpu.CompilerParams(
            dimension_semantics=("parallel", "parallel")),
        cost_estimate=cost,
    )(w_new, src)


def _pick_tile_do(do_, p_plane, cin, planes, itemsize, n_batch):
    """Depth tile (a divisor of Do): stream ~>=1 MiB per grid step, keep the
    double-buffered VMEM footprint under ~12 MiB, prefer an even step count."""
    divisors = [t for t in range(1, do_ + 1) if do_ % t == 0]

    def src_bytes(t):
        return 8 * cin * (t + 1) * p_plane * itemsize

    def vmem_bytes(t):
        lm = (t + 1) * p_plane
        return ((2 * 8 * cin + 27 * cin) * lm * itemsize   # src x2 + patch slab
                + 2 * planes * lm * 4)                      # out x2 (f32 bound)

    fits = [t for t in divisors if vmem_bytes(t) <= (12 << 20)] or divisors[:1]
    big = [t for t in fits if src_bytes(t) >= (1 << 20)]
    tdo = min(big) if big else max(fits)
    if (n_batch * (do_ // tdo)) % 2:                        # v7x: 2 TensorCores
        for t in sorted(fits, key=lambda t: abs(t - tdo)):
            if (n_batch * (do_ // t)) % 2 == 0:
                tdo = t
                break
    return tdo


# ---------------------------------------------------------------------------
# Conv module: XLA glue = pad + 2x2x2 parity split (+ small output epilogue),
# everything gather/matmul-shaped runs inside the Pallas kernel.
# ---------------------------------------------------------------------------
class Conv:
    def __init__(self, inplanes, planes, kernel_size=3, stride=2, dilation=1,
                 dimension=3, key=None, compute_dtype=jnp.bfloat16,
                 channels_last=True):
        assert kernel_size == 3 and stride == 2 and dilation == 1 and dimension == 3
        self.inplanes = inplanes
        self.planes = planes
        self.compute_dtype = compute_dtype
        self.channels_last = channels_last
        if key is None:
            key = jax.random.PRNGKey(0)
        kvol = kernel_size ** dimension
        fan_in = kvol * inplanes
        # ME.MinkowskiConvolution kernel shape: (kernel_volume, Cin, Cout), no bias.
        self.weight = (jax.random.normal(key, (kvol, inplanes, planes),
                                         dtype=jnp.float32)
                       / jnp.sqrt(jnp.float32(fan_in)))
        self._chunks, perm = _build_gather_plan(inplanes)
        self._perm = jnp.asarray(perm, dtype=jnp.int32)
        self._forward_jit = jax.jit(self._forward)

    def __call__(self, x):
        return self._forward_jit(x)

    def _forward(self, x):
        n, d, h, w, cin = x.shape
        assert cin == self.inplanes
        do_, ho, wo = (d + 1) // 2, (h + 1) // 2, (w + 1) // 2
        p_plane = (ho + 1) * (wo + 1)
        cdt = self.compute_dtype
        itemsize = jnp.dtype(cdt).itemsize

        # ---- glue (one fused XLA copy): pad + 2x2x2 parity (phase) split ----
        xp = jnp.pad(x.astype(cdt),
                     ((0, 0), (1, 1 + d % 2), (1, 1 + h % 2), (1, 1 + w % 2),
                      (0, 0)))
        tdo = _pick_tile_do(do_, p_plane, cin, self.planes, itemsize, n)
        ndb = do_ // tdo
        # Depth slabs with a 2-plane halo (duplicated once per block), then a
        # parity split of every axis so all stride-2 taps become pure offsets.
        d_idx = (jnp.arange(ndb)[:, None] * (2 * tdo)
                 + jnp.arange(2 * tdo + 2)[None, :])
        slabs = xp[:, d_idx]                       # (N, ndb, 2tDo+2, Hp, Wp, Cin)
        slabs = slabs.reshape(n, ndb, tdo + 1, 2, ho + 1, 2, wo + 1, 2, cin)
        src = jnp.transpose(slabs, (0, 1, 3, 5, 7, 8, 2, 4, 6))
        lm = (tdo + 1) * p_plane
        src = src.reshape(n, ndb, 8 * cin, lm)     # rows: phase*Cin+ci, lanes: (dz,hz,wz)

        # Weights (27,Cin,Cout) -> (Cout,K), columns permuted to the plan's K order.
        w_t = jnp.transpose(self.weight, (2, 0, 1)).reshape(self.planes, 27 * cin)
        w_new = w_t[:, self._perm].astype(cdt)

        lm_out = tdo * p_plane - (wo + 2)
        o = _fused_conv_pallas(w_new, src, chunks=self._chunks, ho=ho, wo=wo,
                               tdo=tdo, lm_out=lm_out, out_dtype=cdt)

        # ---- epilogue on the small output only: un-flatten (dz,hz,wz), drop
        #      the hz==Ho / wz==Wo junk columns, restore the requested layout.
        o = jnp.pad(o, ((0, 0), (0, 0), (0, 0), (0, tdo * p_plane - lm_out)))
        o = o.reshape(n, ndb, self.planes, tdo, ho + 1, wo + 1)[..., :ho, :wo]
        if self.channels_last:
            return jnp.transpose(o, (0, 1, 3, 4, 5, 2)).reshape(
                n, do_, ho, wo, self.planes)
        return jnp.transpose(o, (0, 2, 1, 3, 4, 5)).reshape(
            n, self.planes, do_, ho, wo)


# ---------------------------------------------------------------------------
if __name__ == "__main__":
    key = jax.random.PRNGKey(0)
    k_x, k_w = jax.random.split(key)

    # Small dense voxel input: batch=2, inplanes=4, spatial 8^3 (NDHWC).
    N, D, H, W, Cin, Cout = 2, 8, 8, 8, 4, 8
    x = jax.random.normal(k_x, (N, D, H, W, Cin), dtype=jnp.float32)

    # Reference: XLA dense 3D conv (NCDHW <-> OIDHW convention), f32.
    conv_f32 = Conv(inplanes=Cin, planes=Cout, kernel_size=3, stride=2,
                    dilation=1, dimension=3, key=k_w,
                    compute_dtype=jnp.float32)
    x_ncdhw = jnp.transpose(x, (0, 4, 1, 2, 3))
    w_oidhw = jnp.transpose(conv_f32.weight.reshape(3, 3, 3, Cin, Cout),
                            (4, 3, 0, 1, 2))
    y_ref = jax.lax.conv_general_dilated(
        x_ncdhw, w_oidhw, window_strides=(2, 2, 2),
        padding=((1, 1), (1, 1), (1, 1)),
        dimension_numbers=("NCDHW", "OIDHW", "NCDHW"))
    y_ref = jnp.transpose(y_ref, (0, 2, 3, 4, 1))  # back to NDHWC

    # f32 compute path: tight check.
    y32 = jax.block_until_ready(conv_f32(x))
    assert y32.shape == y_ref.shape, (y32.shape, y_ref.shape)
    assert jnp.allclose(y32, y_ref, atol=1e-4, rtol=1e-4), \
        float(jnp.max(jnp.abs(y32 - y_ref)))

    # bf16 compute path (default; halves HBM traffic on this mem-bound kernel),
    # f32 MXU accumulation, bf16 output -> loose tolerance vs the f32 reference.
    conv_bf16 = Conv(inplanes=Cin, planes=Cout, kernel_size=3, stride=2,
                     dilation=1, dimension=3, key=k_w,
                     compute_dtype=jnp.bfloat16)
    y16 = jax.block_until_ready(conv_bf16(x)).astype(jnp.float32)
    assert y16.shape == y_ref.shape, (y16.shape, y_ref.shape)
    assert jnp.allclose(y16, y_ref, atol=1e-1, rtol=1e-1), \
        float(jnp.max(jnp.abs(y16 - y_ref)))

    print("KERNEL_OK")
</pallas_src>

<mosaic_0001>
module attributes {stable_mosaic.version = 11 : i64} {
  func.func @kernel(%arg0: i32, %arg1: i32, %arg2: memref<8x108xf32, #tpu.memory_space<vmem>>, %arg3: memref<1x1x32x125xf32, #tpu.memory_space<vmem>>, %arg4: memref<1x1x8x94xf32, #tpu.memory_space<vmem>>, %arg5: memref<108x94xf32, #tpu.memory_space<vmem>>) attributes {dimension_semantics = [#tpu.dimension_semantics<parallel>, #tpu.dimension_semantics<parallel>], iteration_bounds = array<i64: 2, 1>, scalar_prefetch = 0 : i64, scratch_operands = 1 : i64, tpu.core_type = #tpu.core_type<tc>, window_params = [{pipeline_mode = #tpu.pipeline_mode<synchronous>, transform_indices = @transform_0, window_bounds = array<i64: 8, 108>}, {transform_indices = @transform_1, window_bounds = array<i64: 1, 1, 32, 125>}, {transform_indices = @transform_2, window_bounds = array<i64: 1, 1, 8, 94>}]} {
    %c0 = arith.constant 0 : index
    %c0_0 = arith.constant 0 : index
    %c0_1 = arith.constant 0 : index
    %c0_2 = arith.constant 0 : index
    %0 = vector.load %arg3[%c0, %c0_0, %c0_1, %c0_2] : memref<1x1x32x125xf32, #tpu.memory_space<vmem>>, vector<1x1x32x94xf32>
    %1 = vector.shape_cast %0 : vector<1x1x32x94xf32> to vector<32x94xf32>
    %c0_3 = arith.constant 0 : index
    %c0_4 = arith.constant 0 : index
    %2 = vector.load %arg5[%c0_3, %c0_4] : memref<108x94xf32, #tpu.memory_space<vmem>>, vector<32x94xf32>
    tpu.vector_store %arg5[%c0_3, %c0_4], %1 {strides = array<i32>} : memref<108x94xf32, #tpu.memory_space<vmem>>, vector<32x94xf32>,
    %c0_5 = arith.constant 0 : index
    %c0_6 = arith.constant 0 : index
    %c0_7 = arith.constant 0 : index
    %c1 = arith.constant 1 : index
    %3 = vector.load %arg3[%c0_5, %c0_6, %c0_7, %c1] : memref<1x1x32x125xf32, #tpu.memory_space<vmem>>, vector<1x1x4x94xf32>
    %4 = vector.shape_cast %3 : vector<1x1x4x94xf32> to vector<4x94xf32>
    %c32 = arith.constant 32 : index
    %c0_8 = arith.constant 0 : index
    %5 = vector.load %arg5[%c32, %c0_8] : memref<108x94xf32, #tpu.memory_space<vmem>>, vector<4x94xf32>
    tpu.vector_store %arg5[%c32, %c0_8], %4 {strides = array<i32>} : memref<108x94xf32, #tpu.memory_space<vmem>>, vector<4x94xf32>,
    %c0_9 = arith.constant 0 : index
    %c0_10 = arith.constant 0 : index
    %c8 = arith.constant 8 : index
    %c1_11 = arith.constant 1 : index
    %6 = vector.load %arg3[%c0_9, %c0_10, %c8, %c1_11] : memref<1x1x32x125xf32, #tpu.memory_space<vmem>>, vector<1x1x4x94xf32>
    %7 = vector.shape_cast %6 : vector<1x1x4x94xf32> to vector<4x94xf32>
    %c36 = arith.constant 36 : index
    %c0_12 = arith.constant 0 : index
    %8 = vector.load %arg5[%c36, %c0_12] : memref<108x94xf32, #tpu.memory_space<vmem>>, vector<4x94xf32>
    tpu.vector_store %arg5[%c36, %c0_12], %7 {strides = array<i32>} : memref<108x94xf32, #tpu.memory_space<vmem>>, vector<4x94xf32>,
    %c0_13 = arith.constant 0 : index
    %c0_14 = arith.constant 0 : index
    %c16 = arith.constant 16 : index
    %c1_15 = arith.constant 1 : index
    %9 = vector.load %arg3[%c0_13, %c0_14, %c16, %c1_15] : memref<1x1x32x125xf32, #tpu.memory_space<vmem>>, vector<1x1x4x94xf32>
    %10 = vector.shape_cast %9 : vector<1x1x4x94xf32> to vector<4x94xf32>
    %c40 = arith.constant 40 : index
    %c0_16 = arith.constant 0 : index
    %11 = vector.load %arg5[%c40, %c0_16] : memref<108x94xf32, #tpu.memory_space<vmem>>, vector<4x94xf32>
    tpu.vector_store %arg5[%c40, %c0_16], %10 {strides = array<i32>} : memref<108x94xf32, #tpu.memory_space<vmem>>, vector<4x94xf32>,
    %c0_17 = arith.constant 0 : index
    %c0_18 = arith.constant 0 : index
    %c24 = arith.constant 24 : index
    %c1_19 = arith.constant 1 : index
    %12 = vector.load %arg3[%c0_17, %c0_18, %c24, %c1_19] : memref<1x1x32x125xf32, #tpu.memory_space<vmem>>, vector<1x1x4x94xf32>
    %13 = vector.shape_cast %12 : vector<1x1x4x94xf32> to vector<4x94xf32>
    %c44 = arith.constant 44 : index
    %c0_20 = arith.constant 0 : index
    %14 = vector.load %arg5[%c44, %c0_20] : memref<108x94xf32, #tpu.memory_space<vmem>>, vector<4x94xf32>
    tpu.vector_store %arg5[%c44, %c0_20], %13 {strides = array<i32>} : memref<108x94xf32, #tpu.memory_space<vmem>>, vector<4x94xf32>,
    %c0_21 = arith.constant 0 : index
    %c0_22 = arith.constant 0 : index
    %c0_23 = arith.constant 0 : index
    %c5 = arith.constant 5 : index
    %15 = vector.load %arg3[%c0_21, %c0_22, %c0_23, %c5] : memref<1x1x32x125xf32, #tpu.memory_space<vmem>>, vector<1x1x8x94xf32>
    %16 = vector.shape_cast %15 : vector<1x1x8x94xf32> to vector<8x94xf32>
    %c48 = arith.constant 48 : index
    %c0_24 = arith.constant 0 : index
    %17 = vector.load %arg5[%c48, %c0_24] : memref<108x94xf32, #tpu.memory_space<vmem>>, vector<8x94xf32>
    tpu.vector_store %arg5[%c48, %c0_24], %16 {strides = array<i32>} : memref<108x94xf32, #tpu.memory_space<vmem>>, vector<8x94xf32>,
    %c0_25 = arith.constant 0 : index
    %c0_26 = arith.constant 0 : index
    %c16_27 = arith.constant 16 : index
    %c5_28 = arith.constant 5 : index
    %18 = vector.load %arg3[%c0_25, %c0_26, %c16_27, %c5_28] : memref<1x1x32x125xf32, #tpu.memory_space<vmem>>, vector<1x1x8x94xf32>
    %19 = vector.shape_cast %18 : vector<1x1x8x94xf32> to vector<8x94xf32>
    %c56 = arith.constant 56 : index
    %c0_29 = arith.constant 0 : index
    %20 = vector.load %arg5[%c56, %c0_29] : memref<108x94xf32, #tpu.memory_space<vmem>>, vector<8x94xf32>
    tpu.vector_store %arg5[%c56, %c0_29], %19 {strides = array<i32>} : memref<108x94xf32, #tpu.memory_space<vmem>>, vector<8x94xf32>,
    %c0_30 = arith.constant 0 : index
    %c0_31 = arith.constant 0 : index
    %c0_32 = arith.constant 0 : index
    %c6 = arith.constant 6 : index
    %21 = vector.load %arg3[%c0_30, %c0_31, %c0_32, %c6] : memref<1x1x32x125xf32, #tpu.memory_space<vmem>>, vector<1x1x4x94xf32>
    %22 = vector.shape_cast %21 : vector<1x1x4x94xf32> to vector<4x94xf32>
    %c64 = arith.constant 64 : index
    %c0_33 = arith.constant 0 : index
    %23 = vector.load %arg5[%c64, %c0_33] : memref<108x94xf32, #tpu.memory_space<vmem>>, vector<4x94xf32>
    tpu.vector_store %arg5[%c64, %c0_33], %22 {strides = array<i32>} : memref<108x94xf32, #tpu.memory_space<vmem>>, vector<4x94xf32>,
    %c0_34 = arith.constant 0 : index
    %c0_35 = arith.constant 0 : index
    %c16_36 = arith.constant 16 : index
    %c6_37 = arith.constant 6 : index
    %24 = vector.load %arg3[%c0_34, %c0_35, %c16_36, %c6_37] : memref<1x1x32x125xf32, #tpu.memory_space<vmem>>, vector<1x1x4x94xf32>
    %25 = vector.shape_cast %24 : vector<1x1x4x94xf32> to vector<4x94xf32>
    %c68 = arith.constant 68 : index
    %c0_38 = arith.constant 0 : index
    %26 = vector.load %arg5[%c68, %c0_38] : memref<108x94xf32, #tpu.memory_space<vmem>>, vector<4x94xf32>
    tpu.vector_store %arg5[%c68, %c0_38], %25 {strides = array<i32>} : memref<108x94xf32, #tpu.memory_space<vmem>>, vector<4x94xf32>,
    %c0_39 = arith.constant 0 : index
    %c0_40 = arith.constant 0 : index
    %c0_41 = arith.constant 0 : index
    %c25 = arith.constant 25 : index
    %27 = vector.load %arg3[%c0_39, %c0_40, %c0_41, %c25] : memref<1x1x32x125xf32, #tpu.memory_space<vmem>>, vector<1x1x16x94xf32>
    %28 = vector.shape_cast %27 : vector<1x1x16x94xf32> to vector<16x94xf32>
    %c72 = arith.constant 72 : index
    %c0_42 = arith.constant 0 : index
    %29 = vector.load %arg5[%c72, %c0_42] : memref<108x94xf32, #tpu.memory_space<vmem>>, vector<16x94xf32>
    tpu.vector_store %arg5[%c72, %c0_42], %28 {strides = array<i32>} : memref<108x94xf32, #tpu.memory_space<vmem>>, vector<16x94xf32>,
    %c0_43 = arith.constant 0 : index
    %c0_44 = arith.constant 0 : index
    %c0_45 = arith.constant 0 : index
    %c26 = arith.constant 26 : index
    %30 = vector.load %arg3[%c0_43, %c0_44, %c0_45, %c26] : memref<1x1x32x125xf32, #tpu.memory_space<vmem>>, vector<1x1x4x94xf32>
    %31 = vector.shape_cast %30 : vector<1x1x4x94xf32> to vector<4x94xf32>
    %c88 = arith.constant 88 : index
    %c0_46 = arith.constant 0 : index
    %32 = vector.load %arg5[%c88, %c0_46] : memref<108x94xf32, #tpu.memory_space<vmem>>, vector<4x94xf32>
    tpu.vector_store %arg5[%c88, %c0_46], %31 {strides = array<i32>} : memref<108x94xf32, #tpu.memory_space<vmem>>, vector<4x94xf32>,
    %c0_47 = arith.constant 0 : index
    %c0_48 = arith.constant 0 : index
    %c8_49 = arith.constant 8 : index
    %c26_50 = arith.constant 26 : index
    %33 = vector.load %arg3[%c0_47, %c0_48, %c8_49, %c26_50] : memref<1x1x32x125xf32, #tpu.memory_space<vmem>>, vector<1x1x4x94xf32>
    %34 = vector.shape_cast %33 : vector<1x1x4x94xf32> to vector<4x94xf32>
    %c92 = arith.constant 92 : index
    %c0_51 = arith.constant 0 : index
    %35 = vector.load %arg5[%c92, %c0_51] : memref<108x94xf32, #tpu.memory_space<vmem>>, vector<4x94xf32>
    tpu.vector_store %arg5[%c92, %c0_51], %34 {strides = array<i32>} : memref<108x94xf32, #tpu.memory_space<vmem>>, vector<4x94xf32>,
    %c0_52 = arith.constant 0 : index
    %c0_53 = arith.constant 0 : index
    %c0_54 = arith.constant 0 : index
    %c30 = arith.constant 30 : index
    %36 = vector.load %arg3[%c0_52, %c0_53, %c0_54, %c30] : memref<1x1x32x125xf32, #tpu.memory_space<vmem>>, vector<1x1x8x94xf32>
    %37 = vector.shape_cast %36 : vector<1x1x8x94xf32> to vector<8x94xf32>
    %c96 = arith.constant 96 : index
    %c0_55 = arith.constant 0 : index
    %38 = vector.load %arg5[%c96, %c0_55] : memref<108x94xf32, #tpu.memory_space<vmem>>, vector<8x94xf32>
    tpu.vector_store %arg5[%c96, %c0_55], %37 {strides = array<i32>} : memref<108x94xf32, #tpu.memory_space<vmem>>, vector<8x94xf32>,
    %c0_56 = arith.constant 0 : index
    %c0_57 = arith.constant 0 : index
    %c0_58 = arith.constant 0 : index
    %c31 = arith.constant 31 : index
    %39 = vector.load %arg3[%c0_56, %c0_57, %c0_58, %c31] : memref<1x1x32x125xf32, #tpu.memory_space<vmem>>, vector<1x1x4x94xf32>
    %40 = vector.shape_cast %39 : vector<1x1x4x94xf32> to vector<4x94xf32>
    %c104 = arith.constant 104 : index
    %c0_59 = arith.constant 0 : index
    %41 = vector.load %arg5[%c104, %c0_59] : memref<108x94xf32, #tpu.memory_space<vmem>>, vector<4x94xf32>
    tpu.vector_store %arg5[%c104, %c0_59], %40 {strides = array<i32>} : memref<108x94xf32, #tpu.memory_space<vmem>>, vector<4x94xf32>,
    %c0_60 = arith.constant 0 : index
    %c0_61 = arith.constant 0 : index
    %42 = vector.load %arg2[%c0_60, %c0_61] : memref<8x108xf32, #tpu.memory_space<vmem>>, vector<8x108xf32>
    %c0_62 = arith.constant 0 : index
    %c0_63 = arith.constant 0 : index
    %43 = vector.load %arg5[%c0_62, %c0_63] : memref<108x94xf32, #tpu.memory_space<vmem>>, vector<108x94xf32>
    %cst = arith.constant dense<0.000000e+00> : vector<8x94xf32>
    %44 = tpu.matmul %42, %43, %cst {dimension_numbers = #tpu.dot_dimension_numbers<[1], [0], [0], [1], [0, 0, 1, 1], [], []>} : vector<8x108xf32>, vector<108x94xf32>, vector<8x94xf32> -> vector<8x94xf32>
    %c0_64 = arith.constant 0 : index
    %c0_65 = arith.constant 0 : index
    %c0_66 = arith.constant 0 : index
    %c0_67 = arith.constant 0 : index
    %45 = vector.load %arg4[%c0_64, %c0_65, %c0_66, %c0_67] : memref<1x1x8x94xf32, #tpu.memory_space<vmem>>, vector<1x1x8x94xf32>
    %46 = vector.shape_cast %45 : vector<1x1x8x94xf32> to vector<8x94xf32>
    %47 = vector.shape_cast %44 : vector<8x94xf32> to vector<1x1x8x94xf32>
    tpu.vector_store %arg4[%c0_64, %c0_65, %c0_66, %c0_67], %47 {strides = array<i32>} : memref<1x1x8x94xf32, #tpu.memory_space<vmem>>, vector<1x1x8x94xf32>,
    return
  }
  func.func @transform_0(%arg0: i32, %arg1: i32) -> (i32, i32) {
    %c0_i32 = arith.constant 0 : i32
    %c0_i32_0 = arith.constant 0 : i32
    %c0_i32_1 = arith.constant 0 : i32
    return %c0_i32, %c0_i32_0 : i32, i32
  }
  func.func @transform_1(%arg0: i32, %arg1: i32) -> (i32, i32, i32, i32) {
    %c0_i32 = arith.constant 0 : i32
    %c0_i32_0 = arith.constant 0 : i32
    %c0_i32_1 = arith.constant 0 : i32
    return %arg0, %arg1, %c0_i32, %c0_i32_0 : i32, i32, i32, i32
  }
  func.func @transform_2(%arg0: i32, %arg1: i32) -> (i32, i32, i32, i32) {
    %c0_i32 = arith.constant 0 : i32
    %c0_i32_0 = arith.constant 0 : i32
    %c0_i32_1 = arith.constant 0 : i32
    return %arg0, %arg1, %c0_i32, %c0_i32_0 : i32, i32, i32, i32
  }
}

</mosaic_0001>

<bundles_post_ra>
// kernel: _forward.1
= control target key start
LH: loop header
LB: loop body
LE: loop exit
PB: predicated region body
PF: predicated region fallthrough
CT: control target
= control target key end

     0   :  { %s584_s9 = smov 0   ;;  %s586_s10 = smov 0   ;;  %s673_s0 = inlined_call_operand.vmem [shape: f32[8,108], index: 0, kind: input, shape index: {}]   ;;  %s674_s1 = inlined_call_operand.vmem [shape: f32[2,1,32,125], index: 1, kind: input, shape index: {}]   ;;  %s675_s2 = inlined_call_operand.vmem [shape: f32[2,1,8,94], index: 2, kind: output, shape index: {}]  }
   0x1   :  { %s588_s11 = smov 0  }
   0x2 LB: > { %s24_s12 = sadd.s32 1, %s554_s10  ;;  %p448_p0 = scmp.ge.s32.totalorder %s558_s11, 1  ;;  %s558_s11 = sphi %s588_s11, %s12_s11   ;;  %s554_s10 = sphi %s586_s10, %s677_s10   ;;  %s550_s9 = sphi %s584_s9, %s676_s9  }
   0x3   : > { %p26_p1 = scmp.ge.s32.totalorder %s24_s12, 2  ;;  %p132_p2 = scmp.lt.s32.totalorder %s558_s11, 3 }
   0x5   : > { %s679_s12 = smov (%p26_p1, %s24_s12), 0  ;;  %p133_p3 = pnand %p448_p0, %p132_p2 }
   0x6   : > { %p160_p4 = scmp.lt.s32.totalorder (!%p133_p3), %s550_s9, 1  ;;  %s561_s17 = smov (!%p133_p3), 97  }
   0x7   : > { %136 = sbr.rel (%p133_p3) target bundleno = 368 (0x170), region = 28  ;;  %s562_s18 = smov (!%p133_p3), 102  }
   0x8   : > { %s563_s19 = smov (!%p133_p3), 98   ;;  %s564_s20 = smov (!%p133_p3), 103  }
   0x9   : > { %s565_s21 = smov (!%p133_p3), 122   ;;  %s566_s22 = smov (!%p133_p3), 123  }
   0xa   : > { %s567_s23 = smov (!%p133_p3), 127  }
   0xc   : > { %v560_v0 = vmov 0.0   ;;  %s681_s9 = smov (!%p160_p4, %s550_s9), 1  ;;  %vm180_vm0 = vcmask 769024   ;;  %vm568_vm1 = vmmov 0   ;;  %vm190_vm2 = vcmask 764928   ;;  %v270_v42 = vld [vmem:[%s673_s0] sm:$0xff] }
   0xd   : > { %472 = vmatprep.subr.mxu0 %v560_v0  ;;  %s456_s13 = sshll.u32 %s681_s9, 5  ;;  %500 = vmatprep.mubr.msk.f32.mxu0 %vm568_vm1, %v560_v0  ;;  %vm289_vm3 = vcmask 1043456   ;;  %vm285_vm4 = vcmask 883712   ;;  %s451_s26 = sshll.u32 %s681_s9, 3 }
   0xe   : > { %s609_s16 = scalar_lea.vmem %s674_s1, %s456_s13  ;;  %s175_s29 = scalar_lea.vmem %s675_s2, %s451_s26 }
   0xf   : > { %v264_v1 = vld [vmem:[%s609_s16] sm:$0xf]  ;;  %v235_v4 = vld [vmem:[%s609_s16 + $0x8] sm:$0xff]  ;;  %v216_v6 = vld [vmem:[%s609_s16 + $0x10] sm:$0xff] }
  0x10   : > { %v246_v2 = vld [vmem:[%s609_s16] sm:$0xf]  ;;  %266 = vrot.lane.b32.xlu0 %v264_v1, %s561_s17  ;;  %v252_v5 = vld [vmem:[%s609_s16 + $0x8] sm:$0xf]  ;;  %182 = vst.msk [vmem:[#allocation2 + $0x8] sm:$0xff] %vm180_vm0, %v235_v4  ;;  %183 = vst.msk [vmem:[#allocation2 + $0x10] sm:$0xff] %vm180_vm0, %v216_v6 }
  0x11   : > { %v258_v3 = vld [vmem:[%s609_s16] sm:$0xff]  ;;  %248 = vrot.lane.b32.xlu1 %v246_v2, %s562_s18  ;;  %v228_v7 = vld [vmem:[%s609_s16 + $0x10] sm:$0xf]  ;;  %v179_v9 = vld [vmem:[%s609_s16 + $0x18] sm:$0xff] }
  0x12   : > { %181 = vst.msk [vmem:[#allocation2] sm:$0xff] %vm180_vm0, %v258_v3  ;;  %v222_v8 = vld [vmem:[%s609_s16] sm:$0xf]  ;;  %184 = vst.msk [vmem:[#allocation2 + $0x18] sm:$0xff] %vm180_vm0, %v179_v9  ;;  %v204_v10 = vld [vmem:[%s609_s16 + $0x18] sm:$0xf] }
  0x13   : > { %v198_v11 = vld [vmem:[%s609_s16 + $0x10] sm:$0xf]  ;;  %v192_v12 = vld [vmem:[%s609_s16 + $0x8] sm:$0xf]  ;;  %v185_v13 = vld [vmem:[%s609_s16] sm:$0xf] }
  0x14   : > { %260 = vrot.lane.b32.xlu0 %v258_v3, %s563_s19 }
  0x15   : > { %254 = vrot.lane.b32.xlu1 %v252_v5, %s562_s18 }
  0x17   : > { %v273_v39 = vld [vmem:[#allocation2 + $0x10] sm:$0xff]  ;;  %v272_v40 = vld [vmem:[#allocation2 + $0x8] sm:$0xff] }
  0x18   : > { %240 = vrot.lane.b32.xlu0 %v235_v4, %s564_s20 }
  0x19   : > { %238 = vrot.lane.b32.xlu1 %v258_v3, %s564_s20  ;;  %v274_v38 = vld [vmem:[#allocation2 + $0x18] sm:$0xff]  ;;  %v271_v41 = vld [vmem:[#allocation2] sm:$0xff] }
  0x1c   : > { %224 = vrot.lane.b32.xlu0 %v222_v8, %s565_s21 }
  0x1d   : > { %230 = vrot.lane.b32.xlu1 %v228_v7, %s565_s21 }
  0x20   : > { %218 = vrot.lane.b32.xlu0 %v216_v6, %s566_s22 }
  0x21   : > { %212 = vrot.lane.b32.xlu1 %v258_v3, %s566_s22 }
  0x24   : > { %200 = vrot.lane.b32.xlu0 %v198_v11, %s567_s23 }
  0x25   : > { %206 = vrot.lane.b32.xlu1 %v204_v10, %s567_s23 }
  0x28   : > { %187 = vrot.lane.b32.xlu0 %v185_v13, %s567_s23 }
  0x29   : > { %194 = vrot.lane.b32.xlu1 %v192_v12, %s567_s23 }
  0x82   : > { %v267_v14 = vpop.permute.xlu0 %266 }
  0x83   : > { %v249_v15 = vpop.permute.xlu1 %248  ;;  %269 = vst.msk [vmem:[#allocation2 + $0x68] sm:$0xf] %vm190_vm2, %v267_v14 }
  0x84   : > { %251 = vst.msk [vmem:[#allocation2 + $0x58] sm:$0xf] %vm190_vm2, %v249_v15 }
  0x86   : > { %v261_v16 = vpop.permute.xlu0 %260 }
  0x87   : > { %v255_v17 = vpop.permute.xlu1 %254  ;;  %263 = vst.msk [vmem:[#allocation2 + $0x60] sm:$0xff] %vm180_vm0, %v261_v16 }
  0x88   : > { %257 = vst.msk [vmem:[#allocation2 + $0x5c] sm:$0xf] %vm190_vm2, %v255_v17 }
  0x8a   : > { %v241_v18 = vpop.permute.xlu0 %240  ;;  %v284_v20 = vld [vmem:[#allocation2 + $0x68] sm:$0xf] }
  0x8b   : > { %v239_v19 = vpop.permute.xlu1 %238  ;;  %245 = vst.msk [vmem:[#allocation2 + $0x50] sm:$0xff] %vm180_vm0, %v241_v18  ;;  %473 = vmatpush3.msk.msra.mxu0 %vm289_vm3, %v284_v20 }
  0x8c   : > { %244 = vst.msk [vmem:[#allocation2 + $0x48] sm:$0xff] %vm180_vm0, %v239_v19  ;;  %474 = vmatprep.subr.mxu0 %v560_v0 }
  0x8e   : > { %v225_v22 = vpop.permute.xlu0 %224  ;;  %v283_v23 = vld [vmem:[#allocation2 + $0x60] sm:$0xff] }
  0x8f   : > { %v231_v21 = vpop.permute.xlu1 %230  ;;  %227 = vst.msk [vmem:[#allocation2 + $0x40] sm:$0xf] %vm190_vm2, %v225_v22  ;;  %475 = vmatpush3.msra.mxu0 %v283_v23  ;;  %v282_v24 = vld [vmem:[#allocation2 + $0x58] sm:$0xff] }
  0x90   : > { %233 = vst.msk [vmem:[#allocation2 + $0x44] sm:$0xf] %vm190_vm2, %v231_v21  ;;  %476 = vmatprep.subr.mxu0 %v560_v0 }
  0x91   : > { %477 = vmatpush3.msra.mxu0 %v282_v24 }
  0x92   : > { %478 = vmatprep.subr.mxu0 %v560_v0  ;;  %v219_v25 = vpop.permute.xlu0 %218  ;;  %v281_v27 = vld [vmem:[#allocation2 + $0x50] sm:$0xff] }
  0x93   : > { %v213_v26 = vpop.permute.xlu1 %212  ;;  %221 = vst.msk [vmem:[#allocation2 + $0x38] sm:$0xff] %vm180_vm0, %v219_v25  ;;  %479 = vmatpush3.msra.mxu0 %v281_v27  ;;  %v280_v28 = vld [vmem:[#allocation2 + $0x48] sm:$0xff] }
  0x94   : > { %215 = vst.msk [vmem:[#allocation2 + $0x30] sm:$0xff] %vm180_vm0, %v213_v26  ;;  %480 = vmatprep.subr.mxu0 %v560_v0 }
  0x95   : > { %481 = vmatpush3.msra.mxu0 %v280_v28 }
  0x96   : > { %482 = vmatprep.subr.mxu0 %v560_v0  ;;  %v201_v30 = vpop.permute.xlu0 %200 }
  0x97   : > { %v207_v29 = vpop.permute.xlu1 %206  ;;  %v279_v31 = vld [vmem:[#allocation2 + $0x40] sm:$0xff]  ;;  %203 = vst.msk [vmem:[#allocation2 + $0x28] sm:$0xf] %vm190_vm2, %v201_v30 }
  0x98   : > { %209 = vst.msk [vmem:[#allocation2 + $0x2c] sm:$0xf] %vm190_vm2, %v207_v29  ;;  %483 = vmatpush3.msra.mxu0 %v279_v31 }
  0x99   : > { %484 = vmatprep.subr.mxu0 %v560_v0 }
  0x9a   : > { %v188_v33 = vpop.permute.xlu0 %187  ;;  %v278_v34 = vld [vmem:[#allocation2 + $0x38] sm:$0xff] }
  0x9b   : > { %v195_v32 = vpop.permute.xlu1 %194  ;;  %191 = vst.msk [vmem:[#allocation2 + $0x20] sm:$0xf] %vm190_vm2, %v188_v33  ;;  %485 = vmatpush3.msra.mxu0 %v278_v34  ;;  %v277_v35 = vld [vmem:[#allocation2 + $0x30] sm:$0xff] }
  0x9c   : > { %197 = vst.msk [vmem:[#allocation2 + $0x24] sm:$0xf] %vm190_vm2, %v195_v32  ;;  %486 = vmatprep.subr.mxu0 %v560_v0 }
  0x9d   : > { %487 = vmatpush3.msra.mxu0 %v277_v35 }
  0x9e   : > { %488 = vmatprep.subr.mxu0 %v560_v0 }
  0x9f   : > { %v276_v36 = vld [vmem:[#allocation2 + $0x28] sm:$0xff] }
  0xa0   : > { %489 = vmatpush3.msra.mxu0 %v276_v36 }
  0xa1   : > { %490 = vmatprep.subr.mxu0 %v560_v0 }
  0xa3   : > { %v275_v37 = vld [vmem:[#allocation2 + $0x20] sm:$0xff] }
  0xa4   : > { %491 = vmatpush3.msra.mxu0 %v275_v37 }
  0xa5   : > { %492 = vmatprep.subr.mxu0 %v560_v0 }
  0xa6   : > { %493 = vmatpush3.msra.mxu0 %v274_v38 }
  0xa7   : > { %494 = vmatprep.subr.mxu0 %v560_v0 }
  0xa8   : > { %495 = vmatpush3.msra.mxu0 %v273_v39 }
  0xa9   : > { %496 = vmatprep.subr.mxu0 %v560_v0 }
  0xaa   : > { %497 = vmatpush3.msra.mxu0 %v272_v40 }
  0xab   : > { %498 = vmatprep.subr.mxu0 %v560_v0 }
  0xac   : > { %499 = vmatpush3.msra.mxu0 %v271_v41 }
  0xad   : > { %501 = vmatmul.mubr.msk.f32.vlgmr.msra.gmra.mxu0 %vm285_vm4, %v270_v42 }
 0x16d   : > { %v359_v43 = vpop.f32.mrf.mxu0 }
 0x16e   : > { %363 = vst.msk [vmem:[%s175_s29] sm:$0xff] %vm180_vm0, %v359_v43 }
 0x16f   : > { %v502_v44 = vpop.f32.mrf.mxu0 }
 0x170 PF: > { %s12_s11 = sadd.s32 1, %s558_s11   ;;  %s676_s9 = smov %s554_s10 }
 0x171   : > { %p9_p5 = scmp.ge.s32.totalorder %s12_s11, 4   ;;  %s677_s10 = smov %s679_s12 }
 0x173   :  { %11 = sbr.rel (!%p9_p5) target bundleno = 2 (0x2), region = 58 }

</bundles_post_ra>
